<compile_context>
chip_gen: v7x
topology: tpu7x:2x2x1
jax: 0.10.0
libtpu: 0.0.40
codegen_flags: <defaults>
</compile_context>

<pallas_src>
import jax
import jax.numpy as jnp
from jax import lax
from jax.experimental import pallas as pl
from jax.experimental.pallas import tpu as pltpu

# LIF hyper-parameters (from LocalLIF(0.5, 0.1, 0.1, 5, RandomSampler()))
LIF_DECAY = 0.5
LIF_VTH = 0.1
LIF_VRESET = 0.1
LIF_STEPS = 5

# Feature sizes of the module.
F_IN, F_H1, F_H2, F_OUT = 16, 32, 16, 10


def _lif(x):
    """Leaky integrate-and-fire over LIF_STEPS with constant input current.

    Elementwise, shape preserving. Returns mean firing rate in [0, 1].
    Single compare per step; mask reused for reset and spike accumulation.
    """

    def step(_, carry):
        v, spk_sum = carry
        v = LIF_DECAY * v + x
        mask = v >= LIF_VTH
        v = jnp.where(mask, LIF_VRESET, v)  # hard reset on spike
        return (v, spk_sum + mask.astype(jnp.float32))

    v0 = jnp.zeros_like(x)
    s0 = jnp.zeros_like(x)
    _, spk_sum = lax.fori_loop(0, LIF_STEPS, step, (v0, s0), unroll=True)
    return spk_sum * (1.0 / LIF_STEPS)


def snn_kernel(x_ref, w1_ref, b1_ref, w2_ref, b2_ref, w3_ref, b3_ref, out_ref):
    # Feature-major: activations are [features, batch_tile].
    # fc1: [32,16] @ [16,TB] + [32,1]
    h = (
        jnp.dot(w1_ref[...], x_ref[...], preferred_element_type=jnp.float32)
        + b1_ref[...]
    )
    # snn1 (elementwise, lane-dense over batch)
    h = _lif(h)
    # fc2: [16,32] @ [32,TB] + [16,1]
    h = (
        jnp.dot(w2_ref[...], h, preferred_element_type=jnp.float32)
        + b2_ref[...]
    )
    # snn2
    h = _lif(h)
    # fc3: [10,16] @ [16,TB] + [10,1]
    out = (
        jnp.dot(w3_ref[...], h, preferred_element_type=jnp.float32)
        + b3_ref[...]
    )
    out_ref[...] = out.astype(out_ref.dtype)


def multilayer_snn(x, params, tb=512):
    """x: [B, 16] float32 -> [B, 10] float32.

    params are in the math-natural layout (w: [in, out], b: [1, out]); the
    wrapper transposes once to the kernel's feature-major layout (ideally these
    would be stored pre-transposed).
    """
    w1, b1, w2, b2, w3, b3 = params
    B = x.shape[0]

    # Batch tile: multiple of 128 (lane width), no bigger than the padded batch.
    b128 = ((B + 127) // 128) * 128
    tb = max(128, min((tb // 128) * 128, b128))
    Bp = ((B + tb - 1) // tb) * tb
    grid = (Bp // tb,)

    # Pad batch, go feature-major (batch on the 128-lane axis).
    x_t = jnp.pad(x, ((0, Bp - B), (0, 0))).T            # [16, Bp]
    w1t, w2t, w3t = w1.T, w2.T, w3.T                      # [out, in]
    b1t, b2t, b3t = b1.T, b2.T, b3.T                      # [out, 1]

    const = lambda i: (0, 0)
    out_t = pl.pallas_call(
        snn_kernel,
        out_shape=jax.ShapeDtypeStruct((F_OUT, Bp), jnp.float32),
        grid=grid,
        in_specs=[
            pl.BlockSpec((F_IN, tb), lambda i: (0, i)),   # x tile
            pl.BlockSpec((F_H1, F_IN), const),            # w1 (resident)
            pl.BlockSpec((F_H1, 1), const),               # b1
            pl.BlockSpec((F_H2, F_H1), const),            # w2
            pl.BlockSpec((F_H2, 1), const),               # b2
            pl.BlockSpec((F_OUT, F_H2), const),           # w3
            pl.BlockSpec((F_OUT, 1), const),              # b3
        ],
        out_specs=pl.BlockSpec((F_OUT, tb), lambda i: (0, i)),
        compiler_params=pltpu.CompilerParams(
            dimension_semantics=("parallel",),            # 2-TC sharding on v7x
        ),
    )(x_t, w1t, b1t, w2t, b2t, w3t, b3t)

    return out_t.T[:B]                                    # [B, 10]


def init_params(key):
    """Deterministic SparseDense parameters; sparsity mask folded into weights."""

    def sparse_dense(key, fan_in, fan_out, sparsity=0.5):
        kw, km = jax.random.split(key)
        bound = 1.0 / jnp.sqrt(fan_in)
        w = jax.random.uniform(
            kw, (fan_in, fan_out), jnp.float32, minval=-bound, maxval=bound
        )
        mask = (jax.random.uniform(km, (fan_in, fan_out)) > sparsity).astype(
            jnp.float32
        )
        b = jnp.zeros((1, fan_out), jnp.float32)
        return w * mask, b

    k1, k2, k3 = jax.random.split(key, 3)
    w1, b1 = sparse_dense(k1, F_IN, F_H1)
    w2, b2 = sparse_dense(k2, F_H1, F_H2)
    w3, b3 = sparse_dense(k3, F_H2, F_OUT)
    return (w1, b1, w2, b2, w3, b3)


if __name__ == "__main__":
    key = jax.random.PRNGKey(0)
    k_params, k_x = jax.random.split(key)
    params = init_params(k_params)

    B = 8
    x = jax.random.normal(k_x, (B, F_IN), jnp.float32)

    out = multilayer_snn(x, params)
    out = jax.block_until_ready(out)
    assert out.shape == (B, F_OUT) and out.dtype == jnp.float32
    print("KERNEL_OK")
</pallas_src>

<mosaic_0001>
module attributes {stable_mosaic.version = 11 : i64} {
  func.func @snn_kernel(%arg0: i32, %arg1: memref<16x128xf32, #tpu.memory_space<vmem>>, %arg2: memref<32x16xf32, #tpu.memory_space<vmem>>, %arg3: memref<32x1xf32, #tpu.memory_space<vmem>>, %arg4: memref<16x32xf32, #tpu.memory_space<vmem>>, %arg5: memref<16x1xf32, #tpu.memory_space<vmem>>, %arg6: memref<10x16xf32, #tpu.memory_space<vmem>>, %arg7: memref<10x1xf32, #tpu.memory_space<vmem>>, %arg8: memref<10x128xf32, #tpu.memory_space<vmem>>) attributes {dimension_semantics = [#tpu.dimension_semantics<parallel>], iteration_bounds = array<i64: 1>, scalar_prefetch = 0 : i64, scratch_operands = 0 : i64, tpu.core_type = #tpu.core_type<tc>, window_params = [{transform_indices = @transform_0, window_bounds = array<i64: 16, 128>}, {pipeline_mode = #tpu.pipeline_mode<synchronous>, transform_indices = @transform_1, window_bounds = array<i64: 32, 16>}, {pipeline_mode = #tpu.pipeline_mode<synchronous>, transform_indices = @transform_2, window_bounds = array<i64: 32, 1>}, {pipeline_mode = #tpu.pipeline_mode<synchronous>, transform_indices = @transform_3, window_bounds = array<i64: 16, 32>}, {pipeline_mode = #tpu.pipeline_mode<synchronous>, transform_indices = @transform_4, window_bounds = array<i64: 16, 1>}, {pipeline_mode = #tpu.pipeline_mode<synchronous>, transform_indices = @transform_5, window_bounds = array<i64: 10, 16>}, {pipeline_mode = #tpu.pipeline_mode<synchronous>, transform_indices = @transform_6, window_bounds = array<i64: 10, 1>}, {transform_indices = @transform_7, window_bounds = array<i64: 10, 128>}]} {
    %c0 = arith.constant 0 : index
    %c0_0 = arith.constant 0 : index
    %0 = vector.load %arg2[%c0, %c0_0] : memref<32x16xf32, #tpu.memory_space<vmem>>, vector<32x16xf32>
    %c0_1 = arith.constant 0 : index
    %c0_2 = arith.constant 0 : index
    %1 = vector.load %arg1[%c0_1, %c0_2] : memref<16x128xf32, #tpu.memory_space<vmem>>, vector<16x128xf32>
    %cst = arith.constant dense<0.000000e+00> : vector<32x128xf32>
    %2 = tpu.matmul %0, %1, %cst {dimension_numbers = #tpu.dot_dimension_numbers<[1], [0], [0], [1], [0, 0, 1, 1], [], []>} : vector<32x16xf32>, vector<16x128xf32>, vector<32x128xf32> -> vector<32x128xf32>
    %c0_3 = arith.constant 0 : index
    %c0_4 = arith.constant 0 : index
    %3 = vector.load %arg3[%c0_3, %c0_4] : memref<32x1xf32, #tpu.memory_space<vmem>>, vector<32x1xf32>
    %4 = vector.broadcast %3 : vector<32x1xf32> to vector<32x128xf32>
    %5 = arith.addf %2, %4 : vector<32x128xf32>
    %cst_5 = arith.constant 0.000000e+00 : f32
    %6 = vector.broadcast %cst_5 : f32 to vector<32x128xf32>
    %cst_6 = arith.constant 0.000000e+00 : f32
    %7 = vector.broadcast %cst_6 : f32 to vector<32x128xf32>
    %c0_i32 = arith.constant 0 : i32
    %cst_7 = arith.constant 5.000000e-01 : f32
    %8 = vector.broadcast %cst_7 : f32 to vector<32x128xf32>
    %9 = arith.mulf %8, %6 : vector<32x128xf32>
    %10 = arith.addf %9, %5 : vector<32x128xf32>
    %cst_8 = arith.constant 1.000000e-01 : f32
    %11 = vector.broadcast %cst_8 : f32 to vector<32x128xf32>
    %12 = arith.cmpf oge, %10, %11 : vector<32x128xf32>
    %cst_9 = arith.constant 1.000000e-01 : f32
    %13 = vector.broadcast %cst_9 : f32 to vector<32x128xf32>
    %14 = arith.select %12, %13, %10 : vector<32x128xi1>, vector<32x128xf32>
    %15 = arith.extui %12 : vector<32x128xi1> to vector<32x128xi32>
    %16 = arith.sitofp %15 : vector<32x128xi32> to vector<32x128xf32>
    %17 = arith.addf %7, %16 : vector<32x128xf32>
    %c1_i32 = arith.constant 1 : i32
    %cst_10 = arith.constant 5.000000e-01 : f32
    %18 = vector.broadcast %cst_10 : f32 to vector<32x128xf32>
    %19 = arith.mulf %18, %14 : vector<32x128xf32>
    %20 = arith.addf %19, %5 : vector<32x128xf32>
    %cst_11 = arith.constant 1.000000e-01 : f32
    %21 = vector.broadcast %cst_11 : f32 to vector<32x128xf32>
    %22 = arith.cmpf oge, %20, %21 : vector<32x128xf32>
    %cst_12 = arith.constant 1.000000e-01 : f32
    %23 = vector.broadcast %cst_12 : f32 to vector<32x128xf32>
    %24 = arith.select %22, %23, %20 : vector<32x128xi1>, vector<32x128xf32>
    %25 = arith.extui %22 : vector<32x128xi1> to vector<32x128xi32>
    %26 = arith.sitofp %25 : vector<32x128xi32> to vector<32x128xf32>
    %27 = arith.addf %17, %26 : vector<32x128xf32>
    %c2_i32 = arith.constant 2 : i32
    %cst_13 = arith.constant 5.000000e-01 : f32
    %28 = vector.broadcast %cst_13 : f32 to vector<32x128xf32>
    %29 = arith.mulf %28, %24 : vector<32x128xf32>
    %30 = arith.addf %29, %5 : vector<32x128xf32>
    %cst_14 = arith.constant 1.000000e-01 : f32
    %31 = vector.broadcast %cst_14 : f32 to vector<32x128xf32>
    %32 = arith.cmpf oge, %30, %31 : vector<32x128xf32>
    %cst_15 = arith.constant 1.000000e-01 : f32
    %33 = vector.broadcast %cst_15 : f32 to vector<32x128xf32>
    %34 = arith.select %32, %33, %30 : vector<32x128xi1>, vector<32x128xf32>
    %35 = arith.extui %32 : vector<32x128xi1> to vector<32x128xi32>
    %36 = arith.sitofp %35 : vector<32x128xi32> to vector<32x128xf32>
    %37 = arith.addf %27, %36 : vector<32x128xf32>
    %c3_i32 = arith.constant 3 : i32
    %cst_16 = arith.constant 5.000000e-01 : f32
    %38 = vector.broadcast %cst_16 : f32 to vector<32x128xf32>
    %39 = arith.mulf %38, %34 : vector<32x128xf32>
    %40 = arith.addf %39, %5 : vector<32x128xf32>
    %cst_17 = arith.constant 1.000000e-01 : f32
    %41 = vector.broadcast %cst_17 : f32 to vector<32x128xf32>
    %42 = arith.cmpf oge, %40, %41 : vector<32x128xf32>
    %cst_18 = arith.constant 1.000000e-01 : f32
    %43 = vector.broadcast %cst_18 : f32 to vector<32x128xf32>
    %44 = arith.select %42, %43, %40 : vector<32x128xi1>, vector<32x128xf32>
    %45 = arith.extui %42 : vector<32x128xi1> to vector<32x128xi32>
    %46 = arith.sitofp %45 : vector<32x128xi32> to vector<32x128xf32>
    %47 = arith.addf %37, %46 : vector<32x128xf32>
    %c4_i32 = arith.constant 4 : i32
    %cst_19 = arith.constant 5.000000e-01 : f32
    %48 = vector.broadcast %cst_19 : f32 to vector<32x128xf32>
    %49 = arith.mulf %48, %44 : vector<32x128xf32>
    %50 = arith.addf %49, %5 : vector<32x128xf32>
    %cst_20 = arith.constant 1.000000e-01 : f32
    %51 = vector.broadcast %cst_20 : f32 to vector<32x128xf32>
    %52 = arith.cmpf oge, %50, %51 : vector<32x128xf32>
    %cst_21 = arith.constant 1.000000e-01 : f32
    %53 = vector.broadcast %cst_21 : f32 to vector<32x128xf32>
    %54 = arith.select %52, %53, %50 : vector<32x128xi1>, vector<32x128xf32>
    %55 = arith.extui %52 : vector<32x128xi1> to vector<32x128xi32>
    %56 = arith.sitofp %55 : vector<32x128xi32> to vector<32x128xf32>
    %57 = arith.addf %47, %56 : vector<32x128xf32>
    %cst_22 = arith.constant 2.000000e-01 : f32
    %58 = vector.broadcast %cst_22 : f32 to vector<32x128xf32>
    %59 = arith.mulf %57, %58 : vector<32x128xf32>
    %c0_23 = arith.constant 0 : index
    %c0_24 = arith.constant 0 : index
    %60 = vector.load %arg4[%c0_23, %c0_24] : memref<16x32xf32, #tpu.memory_space<vmem>>, vector<16x32xf32>
    %cst_25 = arith.constant dense<0.000000e+00> : vector<16x128xf32>
    %61 = tpu.matmul %60, %59, %cst_25 {dimension_numbers = #tpu.dot_dimension_numbers<[1], [0], [0], [1], [0, 0, 1, 1], [], []>} : vector<16x32xf32>, vector<32x128xf32>, vector<16x128xf32> -> vector<16x128xf32>
    %c0_26 = arith.constant 0 : index
    %c0_27 = arith.constant 0 : index
    %62 = vector.load %arg5[%c0_26, %c0_27] : memref<16x1xf32, #tpu.memory_space<vmem>>, vector<16x1xf32>
    %63 = vector.broadcast %62 : vector<16x1xf32> to vector<16x128xf32>
    %64 = arith.addf %61, %63 : vector<16x128xf32>
    %cst_28 = arith.constant 0.000000e+00 : f32
    %65 = vector.broadcast %cst_28 : f32 to vector<16x128xf32>
    %cst_29 = arith.constant 0.000000e+00 : f32
    %66 = vector.broadcast %cst_29 : f32 to vector<16x128xf32>
    %c0_i32_30 = arith.constant 0 : i32
    %cst_31 = arith.constant 5.000000e-01 : f32
    %67 = vector.broadcast %cst_31 : f32 to vector<16x128xf32>
    %68 = arith.mulf %67, %65 : vector<16x128xf32>
    %69 = arith.addf %68, %64 : vector<16x128xf32>
    %cst_32 = arith.constant 1.000000e-01 : f32
    %70 = vector.broadcast %cst_32 : f32 to vector<16x128xf32>
    %71 = arith.cmpf oge, %69, %70 : vector<16x128xf32>
    %cst_33 = arith.constant 1.000000e-01 : f32
    %72 = vector.broadcast %cst_33 : f32 to vector<16x128xf32>
    %73 = arith.select %71, %72, %69 : vector<16x128xi1>, vector<16x128xf32>
    %74 = arith.extui %71 : vector<16x128xi1> to vector<16x128xi32>
    %75 = arith.sitofp %74 : vector<16x128xi32> to vector<16x128xf32>
    %76 = arith.addf %66, %75 : vector<16x128xf32>
    %c1_i32_34 = arith.constant 1 : i32
    %cst_35 = arith.constant 5.000000e-01 : f32
    %77 = vector.broadcast %cst_35 : f32 to vector<16x128xf32>
    %78 = arith.mulf %77, %73 : vector<16x128xf32>
    %79 = arith.addf %78, %64 : vector<16x128xf32>
    %cst_36 = arith.constant 1.000000e-01 : f32
    %80 = vector.broadcast %cst_36 : f32 to vector<16x128xf32>
    %81 = arith.cmpf oge, %79, %80 : vector<16x128xf32>
    %cst_37 = arith.constant 1.000000e-01 : f32
    %82 = vector.broadcast %cst_37 : f32 to vector<16x128xf32>
    %83 = arith.select %81, %82, %79 : vector<16x128xi1>, vector<16x128xf32>
    %84 = arith.extui %81 : vector<16x128xi1> to vector<16x128xi32>
    %85 = arith.sitofp %84 : vector<16x128xi32> to vector<16x128xf32>
    %86 = arith.addf %76, %85 : vector<16x128xf32>
    %c2_i32_38 = arith.constant 2 : i32
    %cst_39 = arith.constant 5.000000e-01 : f32
    %87 = vector.broadcast %cst_39 : f32 to vector<16x128xf32>
    %88 = arith.mulf %87, %83 : vector<16x128xf32>
    %89 = arith.addf %88, %64 : vector<16x128xf32>
    %cst_40 = arith.constant 1.000000e-01 : f32
    %90 = vector.broadcast %cst_40 : f32 to vector<16x128xf32>
    %91 = arith.cmpf oge, %89, %90 : vector<16x128xf32>
    %cst_41 = arith.constant 1.000000e-01 : f32
    %92 = vector.broadcast %cst_41 : f32 to vector<16x128xf32>
    %93 = arith.select %91, %92, %89 : vector<16x128xi1>, vector<16x128xf32>
    %94 = arith.extui %91 : vector<16x128xi1> to vector<16x128xi32>
    %95 = arith.sitofp %94 : vector<16x128xi32> to vector<16x128xf32>
    %96 = arith.addf %86, %95 : vector<16x128xf32>
    %c3_i32_42 = arith.constant 3 : i32
    %cst_43 = arith.constant 5.000000e-01 : f32
    %97 = vector.broadcast %cst_43 : f32 to vector<16x128xf32>
    %98 = arith.mulf %97, %93 : vector<16x128xf32>
    %99 = arith.addf %98, %64 : vector<16x128xf32>
    %cst_44 = arith.constant 1.000000e-01 : f32
    %100 = vector.broadcast %cst_44 : f32 to vector<16x128xf32>
    %101 = arith.cmpf oge, %99, %100 : vector<16x128xf32>
    %cst_45 = arith.constant 1.000000e-01 : f32
    %102 = vector.broadcast %cst_45 : f32 to vector<16x128xf32>
    %103 = arith.select %101, %102, %99 : vector<16x128xi1>, vector<16x128xf32>
    %104 = arith.extui %101 : vector<16x128xi1> to vector<16x128xi32>
    %105 = arith.sitofp %104 : vector<16x128xi32> to vector<16x128xf32>
    %106 = arith.addf %96, %105 : vector<16x128xf32>
    %c4_i32_46 = arith.constant 4 : i32
    %cst_47 = arith.constant 5.000000e-01 : f32
    %107 = vector.broadcast %cst_47 : f32 to vector<16x128xf32>
    %108 = arith.mulf %107, %103 : vector<16x128xf32>
    %109 = arith.addf %108, %64 : vector<16x128xf32>
    %cst_48 = arith.constant 1.000000e-01 : f32
    %110 = vector.broadcast %cst_48 : f32 to vector<16x128xf32>
    %111 = arith.cmpf oge, %109, %110 : vector<16x128xf32>
    %cst_49 = arith.constant 1.000000e-01 : f32
    %112 = vector.broadcast %cst_49 : f32 to vector<16x128xf32>
    %113 = arith.select %111, %112, %109 : vector<16x128xi1>, vector<16x128xf32>
    %114 = arith.extui %111 : vector<16x128xi1> to vector<16x128xi32>
    %115 = arith.sitofp %114 : vector<16x128xi32> to vector<16x128xf32>
    %116 = arith.addf %106, %115 : vector<16x128xf32>
    %cst_50 = arith.constant 2.000000e-01 : f32
    %117 = vector.broadcast %cst_50 : f32 to vector<16x128xf32>
    %118 = arith.mulf %116, %117 : vector<16x128xf32>
    %c0_51 = arith.constant 0 : index
    %c0_52 = arith.constant 0 : index
    %119 = vector.load %arg6[%c0_51, %c0_52] : memref<10x16xf32, #tpu.memory_space<vmem>>, vector<10x16xf32>
    %cst_53 = arith.constant dense<0.000000e+00> : vector<10x128xf32>
    %120 = tpu.matmul %119, %118, %cst_53 {dimension_numbers = #tpu.dot_dimension_numbers<[1], [0], [0], [1], [0, 0, 1, 1], [], []>} : vector<10x16xf32>, vector<16x128xf32>, vector<10x128xf32> -> vector<10x128xf32>
    %c0_54 = arith.constant 0 : index
    %c0_55 = arith.constant 0 : index
    %121 = vector.load %arg7[%c0_54, %c0_55] : memref<10x1xf32, #tpu.memory_space<vmem>>, vector<10x1xf32>
    %122 = vector.broadcast %121 : vector<10x1xf32> to vector<10x128xf32>
    %123 = arith.addf %120, %122 : vector<10x128xf32>
    %c0_56 = arith.constant 0 : index
    %c0_57 = arith.constant 0 : index
    %124 = vector.load %arg8[%c0_56, %c0_57] : memref<10x128xf32, #tpu.memory_space<vmem>>, vector<10x128xf32>
    tpu.vector_store %arg8[%c0_56, %c0_57], %123 {strides = array<i32>} : memref<10x128xf32, #tpu.memory_space<vmem>>, vector<10x128xf32>,
    return
  }
  func.func @transform_0(%arg0: i32) -> (i32, i32) {
    %c0_i32 = arith.constant 0 : i32
    %c0_i32_0 = arith.constant 0 : i32
    return %c0_i32, %arg0 : i32, i32
  }
  func.func @transform_1(%arg0: i32) -> (i32, i32) {
    %c0_i32 = arith.constant 0 : i32
    %c0_i32_0 = arith.constant 0 : i32
    %c0_i32_1 = arith.constant 0 : i32
    return %c0_i32, %c0_i32_0 : i32, i32
  }
  func.func @transform_2(%arg0: i32) -> (i32, i32) {
    %c0_i32 = arith.constant 0 : i32
    %c0_i32_0 = arith.constant 0 : i32
    %c0_i32_1 = arith.constant 0 : i32
    return %c0_i32, %c0_i32_0 : i32, i32
  }
  func.func @transform_3(%arg0: i32) -> (i32, i32) {
    %c0_i32 = arith.constant 0 : i32
    %c0_i32_0 = arith.constant 0 : i32
    %c0_i32_1 = arith.constant 0 : i32
    return %c0_i32, %c0_i32_0 : i32, i32
  }
  func.func @transform_4(%arg0: i32) -> (i32, i32) {
    %c0_i32 = arith.constant 0 : i32
    %c0_i32_0 = arith.constant 0 : i32
    %c0_i32_1 = arith.constant 0 : i32
    return %c0_i32, %c0_i32_0 : i32, i32
  }
  func.func @transform_5(%arg0: i32) -> (i32, i32) {
    %c0_i32 = arith.constant 0 : i32
    %c0_i32_0 = arith.constant 0 : i32
    %c0_i32_1 = arith.constant 0 : i32
    return %c0_i32, %c0_i32_0 : i32, i32
  }
  func.func @transform_6(%arg0: i32) -> (i32, i32) {
    %c0_i32 = arith.constant 0 : i32
    %c0_i32_0 = arith.constant 0 : i32
    %c0_i32_1 = arith.constant 0 : i32
    return %c0_i32, %c0_i32_0 : i32, i32
  }
  func.func @transform_7(%arg0: i32) -> (i32, i32) {
    %c0_i32 = arith.constant 0 : i32
    %c0_i32_0 = arith.constant 0 : i32
    return %c0_i32, %arg0 : i32, i32
  }
}

</mosaic_0001>

<bundles_post_ra>
// kernel: tpu_custom_call.1
= control target key start
LH: loop header
LB: loop body
LE: loop exit
PB: predicated region body
PF: predicated region fallthrough
CT: control target
= control target key end

     0   :  { %vm57_vm0 = vcmask 130048   ;;  %v697_v4 = vmov 0   ;;  %s918_s0 = inlined_call_operand.vmem [shape: f32[16,128], index: 0, kind: input, shape index: {}]   ;;  %s919_s1 = inlined_call_operand.vmem [shape: f32[32,16], index: 1, kind: input, shape index: {}]   ;;  %s920_s2 = inlined_call_operand.vmem [shape: f32[32,1], index: 2, kind: input, shape index: {}]   ;;  %s921_s3 = inlined_call_operand.vmem [shape: f32[16,32], index: 3, kind: input, shape index: {}]   ;;  %s922_s4 = inlined_call_operand.vmem [shape: f32[16,1], index: 4, kind: input, shape index: {}]   ;;  %s923_s5 = inlined_call_operand.vmem [shape: f32[10,16], index: 5, kind: input, shape index: {}]   ;;  %s924_s6 = inlined_call_operand.vmem [shape: f32[10,1], index: 6, kind: input, shape index: {}]   ;;  %s925_s7 = inlined_call_operand.hbm [shape: f32[10,128], index: 7, kind: output, shape index: {}]  }
   0x1   :  { %v31_v0 = vld [vmem:[%s918_s0] sm:$0xff]  ;;  %v32_v1 = vld [vmem:[%s918_s0 + $0x8] sm:$0xff]  ;;  %671 = vset.pattern.permute.xlu0 %v697_v4  ;;  %672 = vset.pattern.permute.xlu1 %v697_v4  ;;  %v35_v6 = vld [vmem:[%s920_s2 + $0x10] sm:$0xff] }
   0x2   :  { %v27_v2 = vld [vmem:[%s919_s1] sm:$0xff]  ;;  %v650_v3 = vpack.c.bf16 %v32_v1, %v31_v0  ;;  %v28_v7 = vld [vmem:[%s919_s1 + $0x8] sm:$0xff]  ;;  %49 = vperm.xlu1 %672, %v35_v6  }
   0x3   :  { %626 = vmatprep.mubr.msk.f32.mxu0 %vm57_vm0, %v27_v2  ;;  %v33_v5 = vld [vmem:[%s920_s2] sm:$0xff]  ;;  %v34_v8 = vld [vmem:[%s920_s2 + $0x8] sm:$0xff] }
   0x4   :  { %651 = vmatprep.subr.bf16.mxu0 %v650_v3  ;;  %39 = vperm.xlu0 %671, %v33_v5  }
   0x5   :  { %653 = vmatpush3.bf16.msra.mxu0 %v650_v3 }
   0x6   :  { %12 = vsyncpa [#allocation3], 0  ;;  %v29_v9 = vld [vmem:[%s919_s1 + $0x10] sm:$0xff]  ;;  %v36_v10 = vld [vmem:[%s920_s2 + $0x18] sm:$0xff]  ;;  %vm305_vm1 = vcmask 261120   ;;  %v698_v52 = vmov 0.0  }
   0x7   :  { %v30_v11 = vld [vmem:[%s919_s1 + $0x18] sm:$0xff]  ;;  %54 = vperm.xlu1 %672, %v36_v10   ;;  %v293_v12 = vld [vmem:[%s922_s4] sm:$0xff]  ;;  %v294_v13 = vld [vmem:[%s922_s4 + $0x8] sm:$0xff]  ;;  %s699_s8 = smov [#allocation2]  }
   0x8   :  { %627 = vmatmul.mubr.msk.f32.vlgmr.msra.gmra.mrb[0].mxu0 %vm57_vm0, %v28_v7  ;;  %44 = vperm.xlu0 %671, %v34_v8   ;;  %v457_v14 = vld [vmem:[%s924_s6] sm:$0xff]  ;;  %v458_v15 = vld [vmem:[%s924_s6 + $0x8] sm:$0x3]  ;;  %s557_s9 = sshll.u32 %s699_s8, 4  ;;  %s558_s9 = int_to_ptr.vmem [resolvable:$true] %s557_s9 }
   0x9   :  { %629 = vmatprep.mubr.msk.f32.mxu0 %vm57_vm0, %v29_v9  ;;  %v291_v16 = vld [vmem:[%s921_s3] sm:$0xff]  ;;  %s673_s10 = scalar_lea.vmem %s558_s9, 256  ;;  %p678_p1 = scmp.lt.s32.totalorder %s558_s9, %s558_s9 }
   0xa   :  { %640 = vmatprep.mubr.msk.f32.mxu1 %vm305_vm1, %v291_v16  ;;  %p674_p0 = scmp.ne.s32.totalorder %s558_s9, %s673_s10  ;;  %p679_p2 = scmp.lt.s32.totalorder %s673_s10, %s673_s10 }
   0xb   :  { %302 = vperm.xlu1 %672, %v294_v13  }
   0xc   :  { %630 = vmatmul.mubr.msk.f32.gmra.mrb[2].mxu0 %vm57_vm0, %v30_v11  ;;  %297 = vperm.xlu0 %671, %v293_v12   ;;  %p680_p3 = por %p679_p2, %p678_p1 }
   0xe   :  { %p681_p4 = pnand %p680_p3, %p674_p0 }
   0xf   :  { %466 = vperm.xlu1 %672, %v458_v15  }
  0x10   :  { %461 = vperm.xlu0 %671, %v457_v14  }
  0x81   :  { %v50_v18 = vpop.permute.xlu1 %49 }
  0x83   :  { %v40_v17 = vpop.permute.xlu0 %39 }
  0x86   :  { %v55_v24 = vpop.permute.xlu1 %54 }
  0x87   :  { %v45_v19 = vpop.permute.xlu0 %44 }
  0xdb   :  { %v628_v20 = vpop.f32.mrb[0].mxu0 }
  0xdc   :  { %v792_v21 = vadd.f32 %v628_v20, %v45_v19  ;;  %v136_v22 = vpop.f32.mrb[1].mxu0 }
  0xdd   :  { %v794_v23 = vadd.f32 %v136_v22, %v40_v17 }
  0xde   :  { %vm160_vm2 = vcmp.ge.f32.partialorder %v792_v21, 0.1 }
  0xdf   :  { %v631_v25 = vpop.f32.mrb[2].mxu0  ;;  %vm159_vm3 = vcmp.ge.f32.partialorder %v794_v23, 0.1  ;;  %v164_v26 = vsel %vm160_vm2, 0.1, %v792_v21  ;;  %v573_v60 = vsel %vm160_vm2, 1.0, %v698_v52 }
  0xe0   :  { %v801_v27 = vadd.f32 %v631_v25, %v55_v24  ;;  %v146_v28 = vpop.f32.mrb[3].mxu0  ;;  %v163_v29 = vsel %vm159_vm3, 0.1, %v794_v23  ;;  %v180_v30 = vmul.f32 0.5, %v164_v26  ;;  %v572_v59 = vsel %vm159_vm3, 1.0, %v698_v52 }
  0xe1   :  { %v806_v31 = vadd.f32 %v146_v28, %v50_v18  ;;  %v179_v32 = vmul.f32 0.5, %v163_v29 }
  0xe2   :  { %v184_v33 = vadd.f32 %v180_v30, %v792_v21  ;;  %vm162_vm4 = vcmp.ge.f32.partialorder %v801_v27, 0.1 }
  0xe3   :  { %v183_v34 = vadd.f32 %v179_v32, %v794_v23  ;;  %vm161_vm5 = vcmp.ge.f32.partialorder %v806_v31, 0.1  ;;  %v166_v35 = vsel %vm162_vm4, 0.1, %v801_v27  ;;  %v575_v18 = vsel %vm162_vm4, 1.0, %v698_v52 }
  0xe4   :  { %vm188_vm6 = vcmp.ge.f32.partialorder %v184_v33, 0.1  ;;  %v165_v36 = vsel %vm161_vm5, 0.1, %v806_v31  ;;  %v182_v37 = vmul.f32 0.5, %v166_v35 }
  0xe5   :  { %vm187_vm7 = vcmp.ge.f32.partialorder %v183_v34, 0.1  ;;  %v192_v38 = vsel %vm188_vm6, 0.1, %v184_v33  ;;  %v181_v39 = vmul.f32 0.5, %v165_v36  ;;  %v577_v53 = vsel %vm188_vm6, 1.0, %v698_v52 }
  0xe6   :  { %v191_v40 = vsel %vm187_vm7, 0.1, %v183_v34  ;;  %v208_v41 = vmul.f32 0.5, %v192_v38  ;;  %v186_v44 = vadd.f32 %v182_v37, %v801_v27  ;;  %v576_v55 = vsel %vm187_vm7, 1.0, %v698_v52 }
  0xe7   :  { %v207_v42 = vmul.f32 0.5, %v191_v40  ;;  %v185_v43 = vadd.f32 %v181_v39, %v806_v31  ;;  %v204_v63 = vadd.f32 %v577_v53, %v573_v60  ;;  %v203_v2 = vadd.f32 %v576_v55, %v572_v59  ;;  %v303_v59 = vpop.permute.xlu1 %302 }
  0xe8   :  { %v212_v45 = vadd.f32 %v208_v41, %v792_v21  ;;  %vm190_vm9 = vcmp.ge.f32.partialorder %v186_v44, 0.1 }
  0xe9   :  { %v211_v46 = vadd.f32 %v207_v42, %v794_v23  ;;  %vm189_vm8 = vcmp.ge.f32.partialorder %v185_v43, 0.1  ;;  %v194_v49 = vsel %vm190_vm9, 0.1, %v186_v44  ;;  %v579_v30 = vsel %vm190_vm9, 1.0, %v698_v52 }
  0xea   :  { %vm216_vm10 = vcmp.ge.f32.partialorder %v212_v45, 0.1  ;;  %v193_v47 = vsel %vm189_vm8, 0.1, %v185_v43  ;;  %v210_v58 = vmul.f32 0.5, %v194_v49  ;;  %v578_v29 = vsel %vm189_vm8, 1.0, %v698_v52 }
  0xeb   :  { %vm215_vm11 = vcmp.ge.f32.partialorder %v211_v46, 0.1  ;;  %v220_v48 = vsel %vm216_vm10, 0.1, %v212_v45  ;;  %v209_v57 = vmul.f32 0.5, %v193_v47  ;;  %v581_v61 = vsel %vm216_vm10, 1.0, %v698_v52 }
  0xec   :  { %v219_v50 = vsel %vm215_vm11, 0.1, %v211_v46  ;;  %v236_v51 = vmul.f32 0.5, %v220_v48  ;;  %v214_v1 = vadd.f32 %v210_v58, %v801_v27  ;;  %v580_v4 = vsel %vm215_vm11, 1.0, %v698_v52 }
  0xed   :  { %v235_v54 = vmul.f32 0.5, %v219_v50  ;;  %v213_v0 = vadd.f32 %v209_v57, %v806_v31  ;;  %v232_v5 = vadd.f32 %v581_v61, %v204_v63  ;;  %v231_v14 = vadd.f32 %v580_v4, %v203_v2  ;;  %v298_v61 = vpop.permute.xlu0 %297 }
  0xee   :  { %v240_v56 = vadd.f32 %v236_v51, %v792_v21  ;;  %vm218_vm15 = vcmp.ge.f32.partialorder %v214_v1, 0.1  ;;  %v206_v39 = vadd.f32 %v579_v30, %v575_v18 }
  0xef   :  { %v239_v62 = vadd.f32 %v235_v54, %v794_v23  ;;  %vm217_vm14 = vcmp.ge.f32.partialorder %v213_v0, 0.1  ;;  %v222_v13 = vsel %vm218_vm15, 0.1, %v214_v1  ;;  %v583_v36 = vsel %vm218_vm15, 1.0, %v698_v52 }
  0xf0   :  { %vm244_vm12 = vcmp.ge.f32.partialorder %v240_v56, 0.1  ;;  %v221_v12 = vsel %vm217_vm14, 0.1, %v213_v0  ;;  %v238_v19 = vmul.f32 0.5, %v222_v13  ;;  %v582_v35 = vsel %vm217_vm14, 1.0, %v698_v52 }
  0xf1   :  { %vm243_vm13 = vcmp.ge.f32.partialorder %v239_v62, 0.1  ;;  %v248_v3 = vsel %vm244_vm12, 0.1, %v240_v56  ;;  %v585_v8 = vsel %vm244_vm12, 1.0, %v698_v52  ;;  %v237_v16 = vmul.f32 0.5, %v221_v12 }
  0xf2   :  { %v247_v6 = vsel %vm243_vm13, 0.1, %v239_v62  ;;  %v264_v7 = vmul.f32 0.5, %v248_v3  ;;  %v584_v10 = vsel %vm243_vm13, 1.0, %v698_v52  ;;  %v260_v17 = vadd.f32 %v585_v8, %v232_v5 }
  0xf3   :  { %v263_v9 = vmul.f32 0.5, %v247_v6  ;;  %v259_v20 = vadd.f32 %v584_v10, %v231_v14  ;;  %v242_v26 = vadd.f32 %v238_v19, %v801_v27  ;;  %v234_v46 = vadd.f32 %v583_v36, %v206_v39 }
  0xf4   :  { %v268_v11 = vadd.f32 %v264_v7, %v792_v21  ;;  %v241_v21 = vadd.f32 %v237_v16, %v806_v31 }
  0xf5   :  { %v267_v15 = vadd.f32 %v263_v9, %v794_v23  ;;  %v574_v23 = vsel %vm161_vm5, 1.0, %v698_v52  ;;  %vm246_vm6 = vcmp.ge.f32.partialorder %v242_v26, 0.1 }
  0xf6   :  { %vm272_vm2 = vcmp.ge.f32.partialorder %v268_v11, 0.1  ;;  %vm245_vm4 = vcmp.ge.f32.partialorder %v241_v21, 0.1  ;;  %v250_v37 = vsel %vm246_vm6, 0.1, %v242_v26  ;;  %v205_v38 = vadd.f32 %v578_v29, %v574_v23 }
  0xf7   :  { %vm271_vm3 = vcmp.ge.f32.partialorder %v267_v15, 0.1  ;;  %v589_v22 = vsel %vm272_vm2, 1.0, %v698_v52  ;;  %v249_v33 = vsel %vm245_vm4, 0.1, %v241_v21  ;;  %v266_v41 = vmul.f32 0.5, %v250_v37 }
  0xf8   :  { %v588_v24 = vsel %vm271_vm3, 1.0, %v698_v52  ;;  %v284_v25 = vadd.f32 %v589_v22, %v260_v17  ;;  %v265_v40 = vmul.f32 0.5, %v249_v33  ;;  %v586_v43 = vsel %vm245_vm4, 1.0, %v698_v52 }
  0xf9   :  { %v283_v28 = vadd.f32 %v588_v24, %v259_v20  ;;  %v587_v44 = vsel %vm246_vm6, 1.0, %v698_v52  ;;  %v233_v45 = vadd.f32 %v582_v35, %v205_v38  ;;  %v270_v48 = vadd.f32 %v266_v41, %v801_v27  ;;  %v292_v27 = vld [vmem:[%s921_s3 + $0x8] sm:$0xff] }
  0xfa   :  { %v288_v32 = vmul.f32 0.2, %v284_v25  ;;  %v269_v47 = vadd.f32 %v265_v40, %v806_v31  ;;  %v262_v50 = vadd.f32 %v587_v44, %v234_v46  ;;  %v455_v31 = vld [vmem:[%s923_s5] sm:$0xff] }
  0xfb   :  { %v287_v34 = vmul.f32 0.2, %v283_v28  ;;  %v261_v49 = vadd.f32 %v586_v43, %v233_v45  ;;  %vm274_vm7 = vcmp.ge.f32.partialorder %v270_v48, 0.1  ;;  %647 = vmatprep.mubr.msk.f32.mxu0 %vm57_vm0, %v455_v31  ;;  %v456_v48 = vld [vmem:[%s923_s5 + $0x8] sm:$0x3] }
  0xfc   :  { %vm273_vm5 = vcmp.ge.f32.partialorder %v269_v47, 0.1  ;;  %v591_v53 = vsel %vm274_vm7, 1.0, %v698_v52 }
  0xfd   :  { %v654_v42 = vpack.c.bf16 %v288_v32, %v287_v34  ;;  %v590_v51 = vsel %vm273_vm5, 1.0, %v698_v52  ;;  %v286_v55 = vadd.f32 %v591_v53, %v262_v50 }
  0xfe   :  { %v285_v54 = vadd.f32 %v590_v51, %v261_v49  ;;  %v467_v49 = vpop.permute.xlu1 %466  ;;  %v462_v51 = vpop.permute.xlu0 %461 }
  0xff   :  { %655 = vmatprep.subr.bf16.mxu1 %v654_v42  ;;  %v290_v57 = vmul.f32 0.2, %v286_v55 }
 0x100   :  { %657 = vmatpush3.bf16.msra.mxu1 %v654_v42  ;;  %v289_v56 = vmul.f32 0.2, %v285_v54 }
 0x102   :  { %v658_v58 = vpack.c.bf16 %v290_v57, %v289_v56 }
 0x104   :  { %659 = vmatprep.subr.bf16.mxu1 %v658_v58 }
 0x105   :  { %661 = vmatpush3.bf16.msra.mxu1 %v658_v58 }
 0x108   :  { %641 = vmatmul.mubr.msk.f32.vlgmr.msra.gmra.mrb[0].mxu1 %vm305_vm1, %v292_v27 }
 0x1db   :  { %v642_v60 = vpop.f32.mrb[0].mxu1 }
 0x1dc   :  { %v384_v62 = vadd.f32 %v642_v60, %v303_v59  ;;  %v378_v63 = vpop.f32.mrb[1].mxu1 }
 0x1dd   :  { %v379_v0 = vadd.f32 %v378_v63, %v298_v61 }
 0x1de   :  { %vm390_vm8 = vcmp.ge.f32.partialorder %v384_v62, 0.1 }
 0x1df   :  { %vm389_vm9 = vcmp.ge.f32.partialorder %v379_v0, 0.1  ;;  %v392_v1 = vsel %vm390_vm8, 0.1, %v384_v62  ;;  %v595_v20 = vsel %vm390_vm8, 1.0, %v698_v52 }
 0x1e0   :  { %v391_v2 = vsel %vm389_vm9, 0.1, %v379_v0  ;;  %v400_v3 = vmul.f32 0.5, %v392_v1  ;;  %v594_v21 = vsel %vm389_vm9, 1.0, %v698_v52 }
 0x1e1   :  { %v399_v4 = vmul.f32 0.5, %v391_v2 }
 0x1e2   :  { %v402_v5 = vadd.f32 %v400_v3, %v384_v62 }
 0x1e3   :  { %v401_v6 = vadd.f32 %v399_v4, %v379_v0 }
 0x1e4   :  { %vm404_vm1 = vcmp.ge.f32.partialorder %v402_v5, 0.1 }
 0x1e5   :  { %vm403_vm10 = vcmp.ge.f32.partialorder %v401_v6, 0.1  ;;  %v406_v7 = vsel %vm404_vm1, 0.1, %v402_v5  ;;  %v597_v18 = vsel %vm404_vm1, 1.0, %v698_v52 }
 0x1e6   :  { %v405_v8 = vsel %vm403_vm10, 0.1, %v401_v6  ;;  %v414_v9 = vmul.f32 0.5, %v406_v7  ;;  %v596_v22 = vsel %vm403_vm10, 1.0, %v698_v52  ;;  %v412_v23 = vadd.f32 %v597_v18, %v595_v20 }
 0x1e7   :  { %v413_v10 = vmul.f32 0.5, %v405_v8  ;;  %v411_v30 = vadd.f32 %v596_v22, %v594_v21 }
 0x1e8   :  { %v416_v11 = vadd.f32 %v414_v9, %v384_v62 }
 0x1e9   :  { %v415_v12 = vadd.f32 %v413_v10, %v379_v0 }
 0x1ea   :  { %vm418_vm11 = vcmp.ge.f32.partialorder %v416_v11, 0.1 }
 0x1eb   :  { %vm417_vm12 = vcmp.ge.f32.partialorder %v415_v12, 0.1  ;;  %v420_v13 = vsel %vm418_vm11, 0.1, %v416_v11  ;;  %v599_v24 = vsel %vm418_vm11, 1.0, %v698_v52 }
 0x1ec   :  { %v419_v14 = vsel %vm417_vm12, 0.1, %v415_v12  ;;  %v428_v15 = vmul.f32 0.5, %v420_v13  ;;  %v598_v26 = vsel %vm417_vm12, 1.0, %v698_v52  ;;  %v426_v34 = vadd.f32 %v599_v24, %v412_v23 }
 0x1ed   :  { %v427_v16 = vmul.f32 0.5, %v419_v14  ;;  %v425_v37 = vadd.f32 %v598_v26, %v411_v30 }
 0x1ee   :  { %v430_v17 = vadd.f32 %v428_v15, %v384_v62 }
 0x1ef   :  { %v429_v19 = vadd.f32 %v427_v16, %v379_v0 }
 0x1f0   :  { %vm432_vm13 = vcmp.ge.f32.partialorder %v430_v17, 0.1 }
 0x1f1   :  { %vm431_vm14 = vcmp.ge.f32.partialorder %v429_v19, 0.1  ;;  %v434_v25 = vsel %vm432_vm13, 0.1, %v430_v17  ;;  %v601_v32 = vsel %vm432_vm13, 1.0, %v698_v52 }
 0x1f2   :  { %v433_v28 = vsel %vm431_vm14, 0.1, %v429_v19  ;;  %v442_v29 = vmul.f32 0.5, %v434_v25  ;;  %v600_v35 = vsel %vm431_vm14, 1.0, %v698_v52  ;;  %v440_v39 = vadd.f32 %v601_v32, %v426_v34 }
 0x1f3   :  { %v441_v33 = vmul.f32 0.5, %v433_v28  ;;  %v439_v40 = vadd.f32 %v600_v35, %v425_v37 }
 0x1f4   :  { %v444_v36 = vadd.f32 %v442_v29, %v384_v62 }
 0x1f5   :  { %v443_v38 = vadd.f32 %v441_v33, %v379_v0 }
 0x1f6   :  { %vm446_vm15 = vcmp.ge.f32.partialorder %v444_v36, 0.1 }
 0x1f7   :  { %vm445_vm2 = vcmp.ge.f32.partialorder %v443_v38, 0.1  ;;  %v603_v41 = vsel %vm446_vm15, 1.0, %v698_v52 }
 0x1f8   :  { %v602_v42 = vsel %vm445_vm2, 1.0, %v698_v52  ;;  %v452_v43 = vadd.f32 %v603_v41, %v440_v39 }
 0x1f9   :  { %v451_v44 = vadd.f32 %v602_v42, %v439_v40 }
 0x1fa   :  { %v454_v45 = vmul.f32 0.2, %v452_v43 }
 0x1fb   :  { %v453_v46 = vmul.f32 0.2, %v451_v44 }
 0x1fd   :  { %v662_v47 = vpack.c.bf16 %v454_v45, %v453_v46 }
 0x1ff   :  { %663 = vmatprep.subr.bf16.mxu0 %v662_v47 }
 0x200   :  { %665 = vmatpush3.bf16.msra.mxu0 %v662_v47 }
 0x203   :  { %648 = vmatmul.mubr.msk.f32.vlgmr.msra.gmra.mrb[4].mxu0 %vm57_vm0, %v456_v48 }
 0x2d6   :  { %v649_v50 = vpop.f32.mrb[4].mxu0 }
 0x2d7   :  { %v547_v53 = vadd.f32 %v649_v50, %v467_v49  ;;  %v541_v52 = vpop.f32.mrb[5].mxu0 }
 0x2d8   :  { %v542_v54 = vadd.f32 %v541_v52, %v462_v51 }
 0x2d9   :  { %551 = vst [vmem:[#allocation2 + $0x8] sm:$0x3] %v547_v53 }
 0x2da   :  { %550 = vst [vmem:[#allocation2] sm:$0xff] %v542_v54 }
 0x2db   :  { %684 = shalt.err (!%p681_p4)
}
 0x2dc   :  { %s685_s11 = scalar_lea.hbm %s925_s7, 256 }
 0x2dd   :  { %p686_p5 = scmp.ne.s32.totalorder %s925_s7, %s685_s11  ;;  %p689_p6 = scmp.lt.u32.totalorder %s685_s11, %s925_s7 }
 0x2df   :  { %p691_p7 = pnand %p689_p6, %p686_p5 }
 0x2e1   :  { %694 = shalt.err (!%p691_p7)
}
 0x2e2   :  { %s700_s16 = smov 128   ;;  %s701_s17 = smov 8  }
 0x2e3   :  { %563 = dma.vmem_to_hbm [thread:$0]  %s558_s9, 256, %s925_s7, [#allocation3], %s700_s16, %s700_s16, %s701_s17  }
 0x2e4   :  { %695 = dma.done.wait [#allocation3], 256  }
 0x2e5   :  { %696 = vsyncadd [#allocation3], 4294967040 }
 0x2e6   :  { %567 = vsyncpa [#allocation3], 1 }

</bundles_post_ra>
